<compile_context>
chip_gen: v7x
topology: tpu7x:2x2x1
jax: 0.10.0
libtpu: 0.0.40
codegen_flags: <defaults>
</compile_context>

<pallas_src>
import functools

import jax
import jax.numpy as jnp
from jax.experimental import pallas as pl
from jax.experimental.pallas import tpu as pltpu


def _ordinal_loss_kernel(pred_ref, tgt_ref, out_ref, *,
                         batch_size, tile_rows, num_classes, mask_rows):
    """One batch tile -> one partial (int32) loss sum written to SMEM."""
    i = pl.program_id(0)

    # Native-dtype compute (exact: values are only compared against their own
    # row max).  bf16 stays packed on v6e/v7x; v5e legalizes through f32.
    preds = pred_ref[...]                                    # (tb, C)
    tb, c = tile_rows, num_classes

    # First-occurrence argmax along the class (lane) axis, matching
    # torch.max(x, 1)[1] tie-breaking.
    col = jax.lax.broadcasted_iota(jnp.int32, (tb, c), 1)
    max_val = jnp.max(preds, axis=1, keepdims=True)          # (tb, 1)
    masked_col = jnp.where(preds == max_val, col, jnp.int32(c))

    if mask_rows:
        # Partial last tile: rows past the true batch read garbage.  Force
        # their argmax to 0 so they pair with the zero-padded targets and
        # contribute exactly 0.  (Done in the (tb, C) domain so no sublane-major
        # per-row masking chain is needed.)
        row = i * tb + jax.lax.broadcasted_iota(jnp.int32, (tb, c), 0)
        masked_col = jnp.where(row < batch_size, masked_col, jnp.int32(0))

    # Reduce to a lane-major per-row vector; everything below runs on dense
    # (tb,)-shaped vregs, and targets arrive lane-major so no relayout of the
    # big tensor is required.
    idx = jnp.min(masked_col, axis=1)                        # (tb,) int32
    t = tgt_ref[0, :]                                        # (tb,) int32

    # sum_c((c<=p)-(c<=t))^2 == |p-t|; the ±1 snap zeroes rows with |p-t| == 1.
    diff = jnp.abs(idx - t)
    per_row = jnp.where(diff == 1, jnp.int32(0), diff)

    out_ref[0, 0] = jnp.sum(per_row)                         # exact int32 partial


def _vmem_limit_bytes():
    """Generation-aware VMEM limit: ~half of physical (64 MiB v5e/v6e, 32 MiB v7x)."""
    try:
        cap = int(pltpu.get_tpu_info().vmem_capacity_bytes)
    except Exception:
        cap = 128 * 1024 * 1024
    return max(32 * 1024 * 1024, cap // 2)


def _choose_tile_rows(batch, num_classes, itemsize, vmem_limit):
    """Batch-tile rows sized by real HBM bytes and padded VMEM footprint."""
    if batch <= 8:
        return batch                                   # single block == full array

    lane_pad = ((num_classes + 127) // 128) * 128      # class dim lane-pads to 128s
    # Double-buffered VMEM bytes per tile row: predictions (lane-padded) plus
    # the lane-major (1, tb) int32 targets block (8-sublane padded).
    per_row_vmem = 2 * lane_pad * itemsize + 2 * 8 * 4
    budget = (vmem_limit * 3) // 4                     # headroom for internal scratch
    tb_vmem = max(8, budget // per_row_vmem)

    # ~2 MiB of *real* predictions bytes per grid step amortizes the ~0.35 us
    # fixed per-step overhead; cap rows to bound per-step latency / codegen.
    tb_bytes = (2 << 20) // max(1, num_classes * itemsize)
    tb = min(tb_vmem, max(8, tb_bytes), 16384)

    # Keep >= 2 roughly balanced blocks so the "parallel" grid axis can shard
    # across v7x's two TensorCores.
    half = ((-(-batch // 2)) + 7) // 8 * 8
    tb = min(tb, half)

    return max(8, (tb // 8) * 8)


def ordinal_modified_regression(predictions, targets):
    """predictions: [B, C] float (any float dtype), targets: [B] int -> scalar f32 loss."""
    batch, num_classes = predictions.shape
    itemsize = jnp.dtype(predictions.dtype).itemsize

    vmem_limit = _vmem_limit_bytes()
    tb = _choose_tile_rows(batch, num_classes, itemsize, vmem_limit)
    num_blocks = pl.cdiv(batch, tb)
    padded_rows = num_blocks * tb

    # Lane-major targets: [num_blocks, tb] int32, zero-padded past the batch
    # (targets are tiny, so the pad/reshape is negligible HBM traffic).
    tgt = targets.reshape(-1).astype(jnp.int32)
    if padded_rows != batch:
        tgt = jnp.pad(tgt, (0, padded_rows - batch))
    tgt = tgt.reshape(num_blocks, tb)

    kernel = functools.partial(
        _ordinal_loss_kernel,
        batch_size=batch, tile_rows=tb, num_classes=num_classes,
        mask_rows=(padded_rows != batch))

    partials = pl.pallas_call(
        kernel,
        out_shape=jax.ShapeDtypeStruct((num_blocks, 1), jnp.int32),
        grid=(num_blocks,),
        in_specs=[
            pl.BlockSpec((tb, num_classes), lambda i: (i, 0)),   # predictions, native dtype
            pl.BlockSpec((1, tb), lambda i: (i, 0)),             # targets, lane-major
        ],
        out_specs=pl.BlockSpec((1, 1), lambda i: (i, 0),
                               memory_space=pltpu.MemorySpace.SMEM),
        compiler_params=pltpu.CompilerParams(
            dimension_semantics=("parallel",),       # independent per-tile partials
            vmem_limit_bytes=vmem_limit,
        ),
    )(predictions, tgt)

    # Exact int32 partials; finalize sum + mean with the true global batch size.
    return jnp.sum(partials).astype(jnp.float32) / jnp.float32(batch)


def _reference(predictions, targets):
    """Pure-JAX reference mirroring the PyTorch forward."""
    _, num_classes = predictions.shape
    idx = jnp.argmax(predictions, axis=1).astype(jnp.int32)
    t = targets.astype(jnp.int32)
    adj = jnp.where(jnp.abs(idx - t) == 1, t, idx)
    col = jnp.arange(num_classes, dtype=jnp.int32)[None, :]
    mp = (col <= adj[:, None]).astype(jnp.float32)
    mt = (col <= t[:, None]).astype(jnp.float32)
    return jnp.mean(jnp.sum((mp - mt) ** 2, axis=1))


if __name__ == "__main__":
    key = jax.random.PRNGKey(0)
    k1, k2, k3, k4 = jax.random.split(key, 4)

    # Case 1: single tile (B=8, C=16).
    B1, C1 = 8, 16
    preds1 = jax.random.normal(k1, (B1, C1), dtype=jnp.float32)
    tgts1 = jax.random.randint(k2, (B1,), 0, C1, dtype=jnp.int32)
    loss1 = ordinal_modified_regression(preds1, tgts1)
    jax.block_until_ready(loss1)
    ref1 = _reference(preds1, tgts1)
    assert jnp.allclose(loss1, ref1, atol=1e-6), (loss1, ref1)

    # Case 2: multi-block grid with a masked partial last tile (B=20 -> tb=16, grid=(2,)).
    B2, C2 = 20, 16
    preds2 = jax.random.normal(k3, (B2, C2), dtype=jnp.float32)
    tgts2 = jax.random.randint(k4, (B2,), 0, C2, dtype=jnp.int32)
    loss2 = ordinal_modified_regression(preds2, tgts2)
    jax.block_until_ready(loss2)
    ref2 = _reference(preds2, tgts2)
    assert jnp.allclose(loss2, ref2, atol=1e-6), (loss2, ref2)

    print("KERNEL_OK")
</pallas_src>

<mosaic_0001>
module attributes {stable_mosaic.version = 11 : i64} {
  func.func @_ordinal_loss_kernel(%arg0: i32, %arg1: memref<8x16xf32, #tpu.memory_space<vmem>>, %arg2: memref<1x8xi32, #tpu.memory_space<vmem>>, %arg3: memref<1x1xi32, #tpu.memory_space<smem>>) attributes {dimension_semantics = [#tpu.dimension_semantics<parallel>], iteration_bounds = array<i64: 1>, scalar_prefetch = 0 : i64, scratch_operands = 0 : i64, tpu.core_type = #tpu.core_type<tc>, window_params = [{transform_indices = @transform_0, window_bounds = array<i64: 8, 16>}, {transform_indices = @transform_1, window_bounds = array<i64: 1, 8>}, {transform_indices = @transform_2, window_bounds = array<i64: 1, 1>}]} {
    %c0 = arith.constant 0 : index
    %c0_0 = arith.constant 0 : index
    %0 = vector.load %arg1[%c0, %c0_0] : memref<8x16xf32, #tpu.memory_space<vmem>>, vector<8x16xf32>
    %1 = tpu.iota {dimensions = array<i32: 1>} : vector<8x16xi32>
    %cst = arith.constant dense<0xFF800000> : vector<8xf32>
    %2 = vector.multi_reduction <maximumf>, %0, %cst [1] : vector<8x16xf32> to vector<8xf32>
    %3 = vector.shape_cast %2 : vector<8xf32> to vector<8x1xf32>
    %4 = vector.broadcast %3 : vector<8x1xf32> to vector<8x16xf32>
    %5 = arith.cmpf oeq, %0, %4 : vector<8x16xf32>
    %c16_i32 = arith.constant 16 : i32
    %6 = vector.broadcast %c16_i32 : i32 to vector<8x16xi32>
    %7 = arith.select %5, %1, %6 : vector<8x16xi1>, vector<8x16xi32>
    %cst_1 = arith.constant dense<2147483647> : vector<8xi32>
    %8 = vector.multi_reduction <minsi>, %7, %cst_1 [1] : vector<8x16xi32> to vector<8xi32>
    %c0_2 = arith.constant 0 : index
    %c0_3 = arith.constant 0 : index
    %9 = vector.load %arg2[%c0_2, %c0_3] : memref<1x8xi32, #tpu.memory_space<vmem>>, vector<1x8xi32>
    %10 = vector.shape_cast %9 : vector<1x8xi32> to vector<8xi32>
    %11 = arith.subi %8, %10 : vector<8xi32>
    %12 = math.absi %11 : vector<8xi32>
    %c1_i32 = arith.constant 1 : i32
    %13 = vector.broadcast %c1_i32 : i32 to vector<8xi32>
    %14 = arith.cmpi eq, %12, %13 : vector<8xi32>
    %c0_i32 = arith.constant 0 : i32
    %15 = vector.broadcast %c0_i32 : i32 to vector<8xi32>
    %16 = arith.select %14, %15, %12 : vector<8xi1>, vector<8xi32>
    %17 = vector.shape_cast %16 : vector<8xi32> to vector<1x8xi32>
    %cst_4 = arith.constant dense<0> : vector<1xi32>
    %18 = vector.multi_reduction <add>, %17, %cst_4 [1] : vector<1x8xi32> to vector<1xi32>
    %19 = vector.shape_cast %18 : vector<1xi32> to vector<1x1xi32>
    %20 = vector.extract %19[0, 0] : i32 from vector<1x1xi32>
    %c0_5 = arith.constant 0 : index
    %c0_6 = arith.constant 0 : index
    %21 = memref.load %arg3[%c0_5, %c0_6] : memref<1x1xi32, #tpu.memory_space<smem>>
    memref.store %20, %arg3[%c0_5, %c0_6] : memref<1x1xi32, #tpu.memory_space<smem>>
    return
  }
  func.func @transform_0(%arg0: i32) -> (i32, i32) {
    %c0_i32 = arith.constant 0 : i32
    %c0_i32_0 = arith.constant 0 : i32
    return %arg0, %c0_i32 : i32, i32
  }
  func.func @transform_1(%arg0: i32) -> (i32, i32) {
    %c0_i32 = arith.constant 0 : i32
    %c0_i32_0 = arith.constant 0 : i32
    return %arg0, %c0_i32 : i32, i32
  }
  func.func @transform_2(%arg0: i32) -> (i32, i32) {
    %c0_i32 = arith.constant 0 : i32
    %c0_i32_0 = arith.constant 0 : i32
    return %arg0, %c0_i32 : i32, i32
  }
}

</mosaic_0001>

<bundles_post_ra>
// kernel: tpu_custom_call.1
= control target key start
LH: loop header
LB: loop body
LE: loop exit
PB: predicated region body
PF: predicated region fallthrough
CT: control target
= control target key end

     0   :  { %7 = vsyncpa [#allocation3], 0  ;;  %s221_s0 = inlined_call_operand.hbm [shape: f32[8,16], index: 0, kind: input, shape index: {}]   ;;  %s222_s1 = inlined_call_operand.hbm [shape: s32[1,8], index: 1, kind: input, shape index: {}]   ;;  %s223_s2 = inlined_call_operand.hbm [shape: s32[1,1], index: 2, kind: output, shape index: {}]  }
   0x1   :  { %8 = vsyncpa [#allocation6], 0 }
   0x2   :  { %9 = vsyncpa [#allocation4], 0  ;;  %s167_s9 = smov [#allocation2]   ;;  %s168_s11 = smov [#allocation5]  }
   0x3   :  { %s16_s10 = sshll.u32 %s167_s9, 4  ;;  %s26_s12 = sshll.u32 %s168_s11, 4  ;;  %s17_s10 = int_to_ptr.vmem [resolvable:$true] %s16_s10  ;;  %s27_s12 = int_to_ptr.vmem [resolvable:$true] %s26_s12 }
   0x4   :  { %s107_s15 = scalar_lea.hbm %s221_s0, 128 }
   0x5   :  { %p108_p0 = scmp.ne.s32.totalorder %s221_s0, %s107_s15  ;;  %p111_p1 = scmp.lt.u32.totalorder %s107_s15, %s221_s0 }
   0x7   :  { %p113_p2 = pnand %p111_p1, %p108_p0 }
   0x9   :  { %116 = shalt.err (!%p113_p2)
}
   0xa   :  { %s117_s20 = scalar_lea.vmem %s17_s10, 128  ;;  %p122_p4 = scmp.lt.s32.totalorder %s17_s10, %s17_s10 }
   0xb   :  { %p118_p3 = scmp.ne.s32.totalorder %s17_s10, %s117_s20  ;;  %p123_p5 = scmp.lt.s32.totalorder %s117_s20, %s117_s20 }
   0xd   :  { %p124_p6 = por %p123_p5, %p122_p4 }
   0xf   :  { %p125_p7 = pnand %p124_p6, %p118_p3 }
  0x11   :  { %128 = shalt.err (!%p125_p7)
}
  0x12   :  { %19 = dma.hbm_to_vmem [thread:$0]  %s221_s0, 128, %s17_s10, [#allocation3]  }
  0x13   :  { %s129_s25 = scalar_lea.hbm %s222_s1, 16 }
  0x14   :  { %p130_p8 = scmp.ne.s32.totalorder %s222_s1, %s129_s25  ;;  %p133_p9 = scmp.lt.u32.totalorder %s129_s25, %s222_s1 }
  0x16   :  { %p135_p10 = pnand %p133_p9, %p130_p8 }
  0x18   :  { %138 = shalt.err (!%p135_p10)
}
  0x19   :  { %s139_s30 = scalar_lea.vmem %s27_s12, 16  ;;  %s143_s3 = scalar_lea.vmem %s27_s12, 32 }
  0x1a   :  { %p140_p11 = scmp.ne.s32.totalorder %s27_s12, %s139_s30  ;;  %p144_p12 = scmp.lt.s32.totalorder %s27_s12, %s27_s12 }
  0x1b   :  { %p145_p13 = scmp.lt.s32.totalorder %s143_s3, %s139_s30 }
  0x1d   :  { %p146_p0 = por %p145_p13, %p144_p12 }
  0x1f   :  { %p147_p1 = pnand %p146_p0, %p140_p11 }
  0x21   :  { %150 = shalt.err (!%p147_p1)
}
  0x22   :  { %29 = dma.hbm_to_vmem [thread:$0]  %s222_s1, 16, %s27_s12, [#allocation6]  }
  0x23   :  { %161 = dma.done.wait [#allocation3], 128  }
  0x24   :  { %162 = vsyncadd [#allocation3], 4294967168 }
  0x25   :  { %163 = dma.done.wait [#allocation6], 16  }
  0x26   :  { %164 = vsyncadd [#allocation6], 4294967280  ;;  %vm39_vm0 = vcmask 130048   ;;  %v36_v0 = vld [vmem:[#allocation2] sm:$0xff]  ;;  %v37_v2 = vlaneseq  ;;  %v100_v13 = vld [vmem:[#allocation5] ss:$0 sm:$0xff] }
  0x27   :  { %v40_v1 = vsel %vm39_vm0, %v36_v0, -inf  ;;  %vm74_vm3 = vcmask 7168   ;;  %s151_s7 = scalar_lea.hbm %s223_s2, 16 }
  0x28   :  { %41 = vmax.xlane.f32.xlu0 %v40_v1  ;;  %v38_v3 = vand.u32 127, %v37_v2  ;;  %p152_p2 = scmp.ne.s32.totalorder %s223_s2, %s151_s7  ;;  %p155_p3 = scmp.lt.u32.totalorder %s151_s7, %s223_s2 }
  0x2a   :  { %p157_p4 = pnand %p155_p3, %p152_p2 }
  0xb5   :  { %v42_v4 = vpop.xlane.xlu0 %41 }
  0xb6   :  { %vm43_vm1 = vcmp.eq.f32.partialorder %v36_v0, %v42_v4 }
  0xb7   :  { %v44_v5 = vsel %vm43_vm1, %v38_v3, 16 }
  0xb8   :  { %v45_v6 = vsel %vm39_vm0, %v44_v5, 2147483647 }
  0xb9   :  { %v47_v7 = vshra.s32 %v45_v6, 16  ;;  %v46_v9 = vand.u32 65535, %v45_v6 }
  0xbb   :  { %v49_v8 = vcvt.s32.f32 %v47_v7  ;;  %v48_v11 = vcvt.s32.f32 %v46_v9 }
  0xbd   :  { %50 = vmin.xlane.f32.xlu0 %v49_v8 }
 0x14a   :  { %v51_v10 = vpop.xlane.xlu0 %50 }
 0x14b   :  { %vm52_vm2 = vcmp.eq.f32.partialorder %v49_v8, %v51_v10  ;;  %v57_v14 = vcvt.f32.s32 %v51_v10 }
 0x14c   :  { %v53_v12 = vsel %vm52_vm2, %v48_v11, inf }
 0x14d   :  { %54 = vmin.xlane.f32.xlu1 %v53_v12  ;;  %v58_v16 = vshll.u32 %v57_v14, 16 }
 0x15e   :  { %66 = vbcast.lane.b32.xlu1 %v100_v13, 256 }
 0x1da   :  { %v55_v15 = vpop.xlane.xlu1 %54 }
 0x1db   :  { %v56_v17 = vcvt.f32.s32 %v55_v15 }
 0x1dd   :  { %v59_v18 = vadd.s32 %v58_v16, %v56_v17 }
 0x1de   :  { %v67_v19 = vpop.permute.xlu1 %66 }
 0x1df   :  { %v68_v20 = vsub.s32 %v59_v18, %v67_v19 }
 0x1e1   :  { %v70_v21 = vsub.s32 0, %v68_v20 }
 0x1e3   :  { %v101_v22 = vmin.u32 %v70_v21, %v68_v20 }
 0x1e5   :  { %vm72_vm4 = vcmp.eq.s32.totalorder %v101_v22, 1 }
 0x1e6   :  { %v73_v23 = vsel %vm72_vm4, 0, %v101_v22 }
 0x1e7   :  { %v75_v24 = vsel %vm74_vm3, %v73_v23, 0 }
 0x1e8   :  { %v76_v25 = vrot.slane %v75_v24, 4 }
 0x1ea   :  { %v77_v26 = vadd.s32 %v76_v25, %v75_v24 }
 0x1ec   :  { %v78_v27 = vrot.slane %v77_v26, 2 }
 0x1ee   :  { %v79_v28 = vadd.s32 %v78_v27, %v77_v26 }
 0x1f0   :  { %v80_v29 = vrot.slane %v79_v28, 1 }
 0x1f2   :  { %v81_v30 = vadd.s32 %v80_v29, %v79_v28 }
 0x1f4   :  { %102 = vpush %v81_v30 }
 0x225   :  { %s103_s1 = spop %102 }
 0x226   :  { %84 = sst [smem:[#allocation7]] %s103_s1 }
 0x227   :  { %160 = shalt.err (!%p157_p4)
}
 0x228   :  { %s169_s12 = smov [#allocation7]  }
 0x229   :  { %92 = dma.smem_to_hbm %s169_s12, 16, %s223_s2, [#allocation4]  }
 0x22a   :  { %165 = dma.done.wait [#allocation4], 16  }
 0x22b   :  { %166 = vsyncadd [#allocation4], 4294967280 }
 0x22c   :  { %96 = sfence }
 0x22d   :  { %97 = vsyncpa [#allocation3], 1 }
 0x22e   :  { %98 = vsyncpa [#allocation6], 1 }
 0x22f   :  { %99 = vsyncpa [#allocation4], 1 }

</bundles_post_ra>
